<compile_context>
chip_gen: v7x
topology: tpu7x:2x2x1
jax: 0.10.0
libtpu: 0.0.40
codegen_flags: <defaults>
</compile_context>

<pallas_src>
import jax
import jax.numpy as jnp
from jax.experimental import pallas as pl
from jax.experimental.pallas import tpu as pltpu

HIDDEN = 256
LANE = 128
SUBLANE = 8


def _actor_kernel(al_ref, obs_ref, w1_ref, b1_ref, w2_ref, b2_ref,
                  w3_ref, b3_ref, out_ref):
    """Whole forward pass on-chip: 3 MXU matmuls (bf16 in, f32 acc),
    VPU bias/ReLU and EUP tanh in f32, bf16 lane-dense store."""
    act_limit = al_ref[0, 0]

    x = obs_ref[...]
    if x.dtype != jnp.bfloat16:          # accept bf16 obs directly; cast f32 obs once
        x = x.astype(jnp.bfloat16)

    h1 = jnp.dot(x, w1_ref[...], preferred_element_type=jnp.float32) + b1_ref[...]
    h1 = jnp.maximum(h1, 0.0)                                    # ReLU (f32)

    h2 = jnp.dot(h1.astype(jnp.bfloat16), w2_ref[...],
                 preferred_element_type=jnp.float32) + b2_ref[...]
    h2 = jnp.maximum(h2, 0.0)                                    # ReLU (f32)

    a = jnp.dot(h2.astype(jnp.bfloat16), w3_ref[...],
                preferred_element_type=jnp.float32) + b3_ref[...]
    out_ref[...] = (act_limit * jnp.tanh(a)).astype(out_ref.dtype)   # bf16 writeback


def init_actor_params(key, obs_dim, act_dim, hidden=HIDDEN):
    """Deterministic init mimicking PyTorch nn.Linear default:
    U(-1/sqrt(fan_in), 1/sqrt(fan_in)) for both weights and biases. f32."""
    keys = jax.random.split(key, 6)

    def linear(kw, kb, fan_in, fan_out):
        bound = 1.0 / jnp.sqrt(fan_in)
        w = jax.random.uniform(kw, (fan_in, fan_out), jnp.float32, -bound, bound)
        b = jax.random.uniform(kb, (1, fan_out), jnp.float32, -bound, bound)
        return w, b

    w1, b1 = linear(keys[0], keys[1], obs_dim, hidden)
    w2, b2 = linear(keys[2], keys[3], hidden, hidden)
    w3, b3 = linear(keys[4], keys[5], hidden, act_dim)
    return (w1, b1, w2, b2, w3, b3)


def prepare_actor_params(params):
    """One-time prep: cast weights to bf16 for the MXU and pad the last layer to a
    lane-dense (multiple-of-128) output width (zeros beyond act_dim). Biases stay f32.
    obs_dim (K=11) is intentionally NOT padded: the first contraction already costs a
    single MXU pass, so padding would only add obs DMA with zero MXU savings."""
    w1, b1, w2, b2, w3, b3 = params
    act_dim = w3.shape[1]
    n_out = max(LANE, pl.cdiv(act_dim, LANE) * LANE)
    w3p = jnp.zeros((w3.shape[0], n_out), jnp.float32).at[:, :act_dim].set(w3)
    b3p = jnp.zeros((1, n_out), jnp.float32).at[:, :act_dim].set(b3)
    prepped = (w1.astype(jnp.bfloat16), b1.astype(jnp.float32),
               w2.astype(jnp.bfloat16), b2.astype(jnp.float32),
               w3p.astype(jnp.bfloat16), b3p.astype(jnp.float32))
    return prepped, act_dim


def _resident_spec(shape, single_buffer):
    """Weight/bias tile: constant index_map -> VMEM-resident across all grid steps."""
    if single_buffer:
        return pl.BlockSpec(shape, lambda i: (0, 0), pipeline_mode=pl.Buffered(1))
    return pl.BlockSpec(shape, lambda i: (0, 0))


def _pick_batch_tile(B, block_b):
    """Sublane-aligned batch tile, capped at block_b, and small enough that the batch
    grid has >= 2 steps when B allows it (keeps both v7x TensorCores busy)."""
    if B <= SUBLANE:
        return B                       # block == full batch dim (legal, single step)
    tb = min(block_b, B)
    tb = min(tb, SUBLANE * pl.cdiv(pl.cdiv(B, 2), SUBLANE))   # ensure >= 2 grid steps
    return max(SUBLANE, (tb // SUBLANE) * SUBLANE)


def actor_forward(obs, prepared_params, act_dim, act_limit, block_b=1024):
    """obs: [B, obs_dim] f32 (or bf16). Returns [B, act_dim] f32."""
    w1, b1, w2, b2, w3p, b3p = prepared_params
    B, obs_dim = obs.shape
    hidden = w1.shape[1]
    n_out = w3p.shape[1]

    TB = _pick_batch_tile(B, block_b)
    nb = pl.cdiv(B, TB)                # partial last block: OOB rows never written back

    act_limit_arr = jnp.asarray(act_limit, jnp.float32).reshape(1, 1)

    def run(single_buffer_weights):
        return pl.pallas_call(
            _actor_kernel,
            out_shape=jax.ShapeDtypeStruct((B, n_out), jnp.bfloat16),  # bf16 writeback
            grid=(nb,),
            in_specs=[
                pl.BlockSpec(memory_space=pltpu.MemorySpace.SMEM),       # act_limit
                pl.BlockSpec((TB, obs_dim), lambda i: (i, 0)),           # obs (pipelined)
                _resident_spec((obs_dim, hidden), single_buffer_weights),  # w1
                _resident_spec((1, hidden), single_buffer_weights),        # b1
                _resident_spec((hidden, hidden), single_buffer_weights),   # w2
                _resident_spec((1, hidden), single_buffer_weights),        # b2
                _resident_spec((hidden, n_out), single_buffer_weights),    # w3 (padded)
                _resident_spec((1, n_out), single_buffer_weights),         # b3 (padded)
            ],
            out_specs=pl.BlockSpec((TB, n_out), lambda i: (i, 0)),       # lane-dense out
            compiler_params=pltpu.CompilerParams(
                dimension_semantics=("parallel",),        # v7x: split batch over 2 TCs
                vmem_limit_bytes=32 * 1024 * 1024),       # headroom for block_b sweeps
        )(act_limit_arr, obs, w1, b1, w2, b2, w3p, b3p)

    try:
        out = run(True)     # single-buffer the VMEM-resident weights (~200 KiB saved)
    except Exception:       # pipeline_mode unsupported on this Pallas/Mosaic version
        out = run(False)

    return out[:, :act_dim].astype(jnp.float32)


def actor_reference(obs, params, act_limit):
    """Plain-JAX f32 reference of the PyTorch forward for verification."""
    w1, b1, w2, b2, w3, b3 = params
    h = jnp.maximum(obs @ w1 + b1, 0.0)
    h = jnp.maximum(h @ w2 + b2, 0.0)
    return act_limit * jnp.tanh(h @ w3 + b3)


if __name__ == "__main__":
    key = jax.random.PRNGKey(0)
    k_params, k_obs = jax.random.split(key)

    obs_dim, act_dim, act_limit = 11, 3, 2.0   # e.g. Hopper-like dims
    batch = 8

    params = init_actor_params(k_params, obs_dim, act_dim)
    prepared, act_dim_out = prepare_actor_params(params)
    obs = jax.random.normal(k_obs, (batch, obs_dim), dtype=jnp.float32)

    out = actor_forward(obs, prepared, act_dim_out, act_limit)
    out = jax.block_until_ready(out)

    ref = actor_reference(obs, params, act_limit)
    assert out.shape == (batch, act_dim), out.shape
    # bf16 MXU inputs + bf16 output store => ~1e-2-level deviation from f32 reference.
    max_err = float(jnp.max(jnp.abs(out - ref)))
    assert max_err < 3e-2, f"mismatch vs reference: max abs err {max_err}"

    print("KERNEL_OK")
</pallas_src>

<mosaic_0001>
module attributes {stable_mosaic.version = 11 : i64} {
  func.func @_actor_kernel(%arg0: i32, %arg1: memref<1x1xf32, #tpu.memory_space<smem>>, %arg2: memref<8x11xf32, #tpu.memory_space<vmem>>, %arg3: memref<11x256xbf16, #tpu.memory_space<vmem>>, %arg4: memref<1x256xf32, #tpu.memory_space<vmem>>, %arg5: memref<256x256xbf16, #tpu.memory_space<vmem>>, %arg6: memref<1x256xf32, #tpu.memory_space<vmem>>, %arg7: memref<256x128xbf16, #tpu.memory_space<vmem>>, %arg8: memref<1x128xf32, #tpu.memory_space<vmem>>, %arg9: memref<8x128xbf16, #tpu.memory_space<vmem>>) attributes {dimension_semantics = [#tpu.dimension_semantics<parallel>], iteration_bounds = array<i64: 1>, scalar_prefetch = 0 : i64, scratch_operands = 0 : i64, tpu.core_type = #tpu.core_type<tc>, window_params = [{transform_indices = @transform_0, window_bounds = array<i64: 1, 1>}, {transform_indices = @transform_1, window_bounds = array<i64: 8, 11>}, {pipeline_mode = #tpu.pipeline_mode<synchronous>, transform_indices = @transform_2, window_bounds = array<i64: 11, 256>}, {pipeline_mode = #tpu.pipeline_mode<synchronous>, transform_indices = @transform_3, window_bounds = array<i64: 1, 256>}, {pipeline_mode = #tpu.pipeline_mode<synchronous>, transform_indices = @transform_4, window_bounds = array<i64: 256, 256>}, {pipeline_mode = #tpu.pipeline_mode<synchronous>, transform_indices = @transform_5, window_bounds = array<i64: 1, 256>}, {pipeline_mode = #tpu.pipeline_mode<synchronous>, transform_indices = @transform_6, window_bounds = array<i64: 256, 128>}, {pipeline_mode = #tpu.pipeline_mode<synchronous>, transform_indices = @transform_7, window_bounds = array<i64: 1, 128>}, {transform_indices = @transform_8, window_bounds = array<i64: 8, 128>}]} {
    %c0 = arith.constant 0 : index
    %c0_0 = arith.constant 0 : index
    %0 = memref.load %arg1[%c0, %c0_0] : memref<1x1xf32, #tpu.memory_space<smem>>
    %c0_1 = arith.constant 0 : index
    %c0_2 = arith.constant 0 : index
    %1 = vector.load %arg2[%c0_1, %c0_2] : memref<8x11xf32, #tpu.memory_space<vmem>>, vector<8x11xf32>
    %2 = arith.truncf %1 : vector<8x11xf32> to vector<8x11xbf16>
    %c0_3 = arith.constant 0 : index
    %c0_4 = arith.constant 0 : index
    %3 = vector.load %arg3[%c0_3, %c0_4] : memref<11x256xbf16, #tpu.memory_space<vmem>>, vector<11x256xbf16>
    %cst = arith.constant dense<0.000000e+00> : vector<8x256xf32>
    %4 = tpu.matmul %2, %3, %cst {dimension_numbers = #tpu.dot_dimension_numbers<[1], [0], [0], [1], [0, 0, 1, 1], [], []>} : vector<8x11xbf16>, vector<11x256xbf16>, vector<8x256xf32> -> vector<8x256xf32>
    %c0_5 = arith.constant 0 : index
    %c0_6 = arith.constant 0 : index
    %5 = vector.load %arg4[%c0_5, %c0_6] : memref<1x256xf32, #tpu.memory_space<vmem>>, vector<1x256xf32>
    %6 = vector.broadcast %5 : vector<1x256xf32> to vector<8x256xf32>
    %7 = arith.addf %4, %6 : vector<8x256xf32>
    %cst_7 = arith.constant 0.000000e+00 : f32
    %8 = vector.broadcast %cst_7 : f32 to vector<8x256xf32>
    %9 = arith.maximumf %7, %8 : vector<8x256xf32>
    %10 = arith.truncf %9 : vector<8x256xf32> to vector<8x256xbf16>
    %c0_8 = arith.constant 0 : index
    %c0_9 = arith.constant 0 : index
    %11 = vector.load %arg5[%c0_8, %c0_9] : memref<256x256xbf16, #tpu.memory_space<vmem>>, vector<256x256xbf16>
    %cst_10 = arith.constant dense<0.000000e+00> : vector<8x256xf32>
    %12 = tpu.matmul %10, %11, %cst_10 {dimension_numbers = #tpu.dot_dimension_numbers<[1], [0], [0], [1], [0, 0, 1, 1], [], []>} : vector<8x256xbf16>, vector<256x256xbf16>, vector<8x256xf32> -> vector<8x256xf32>
    %c0_11 = arith.constant 0 : index
    %c0_12 = arith.constant 0 : index
    %13 = vector.load %arg6[%c0_11, %c0_12] : memref<1x256xf32, #tpu.memory_space<vmem>>, vector<1x256xf32>
    %14 = vector.broadcast %13 : vector<1x256xf32> to vector<8x256xf32>
    %15 = arith.addf %12, %14 : vector<8x256xf32>
    %cst_13 = arith.constant 0.000000e+00 : f32
    %16 = vector.broadcast %cst_13 : f32 to vector<8x256xf32>
    %17 = arith.maximumf %15, %16 : vector<8x256xf32>
    %18 = arith.truncf %17 : vector<8x256xf32> to vector<8x256xbf16>
    %c0_14 = arith.constant 0 : index
    %c0_15 = arith.constant 0 : index
    %19 = vector.load %arg7[%c0_14, %c0_15] : memref<256x128xbf16, #tpu.memory_space<vmem>>, vector<256x128xbf16>
    %cst_16 = arith.constant dense<0.000000e+00> : vector<8x128xf32>
    %20 = tpu.matmul %18, %19, %cst_16 {dimension_numbers = #tpu.dot_dimension_numbers<[1], [0], [0], [1], [0, 0, 1, 1], [], []>} : vector<8x256xbf16>, vector<256x128xbf16>, vector<8x128xf32> -> vector<8x128xf32>
    %c0_17 = arith.constant 0 : index
    %c0_18 = arith.constant 0 : index
    %21 = vector.load %arg8[%c0_17, %c0_18] : memref<1x128xf32, #tpu.memory_space<vmem>>, vector<1x128xf32>
    %22 = vector.broadcast %21 : vector<1x128xf32> to vector<8x128xf32>
    %23 = arith.addf %20, %22 : vector<8x128xf32>
    %24 = math.tanh %23 : vector<8x128xf32>
    %25 = vector.broadcast %0 : f32 to vector<8x128xf32>
    %26 = arith.mulf %25, %24 : vector<8x128xf32>
    %27 = arith.truncf %26 : vector<8x128xf32> to vector<8x128xbf16>
    %c0_19 = arith.constant 0 : index
    %c0_20 = arith.constant 0 : index
    %28 = vector.load %arg9[%c0_19, %c0_20] : memref<8x128xbf16, #tpu.memory_space<vmem>>, vector<8x128xbf16>
    tpu.vector_store %arg9[%c0_19, %c0_20], %27 {strides = array<i32>} : memref<8x128xbf16, #tpu.memory_space<vmem>>, vector<8x128xbf16>,
    return
  }
  func.func @transform_0(%arg0: i32) -> (i32, i32) {
    %c0_i32 = arith.constant 0 : i32
    %c0_i32_0 = arith.constant 0 : i32
    %c0_i32_1 = arith.constant 0 : i32
    return %c0_i32, %c0_i32_0 : i32, i32
  }
  func.func @transform_1(%arg0: i32) -> (i32, i32) {
    %c0_i32 = arith.constant 0 : i32
    %c0_i32_0 = arith.constant 0 : i32
    return %arg0, %c0_i32 : i32, i32
  }
  func.func @transform_2(%arg0: i32) -> (i32, i32) {
    %c0_i32 = arith.constant 0 : i32
    %c0_i32_0 = arith.constant 0 : i32
    %c0_i32_1 = arith.constant 0 : i32
    return %c0_i32, %c0_i32_0 : i32, i32
  }
  func.func @transform_3(%arg0: i32) -> (i32, i32) {
    %c0_i32 = arith.constant 0 : i32
    %c0_i32_0 = arith.constant 0 : i32
    %c0_i32_1 = arith.constant 0 : i32
    return %c0_i32, %c0_i32_0 : i32, i32
  }
  func.func @transform_4(%arg0: i32) -> (i32, i32) {
    %c0_i32 = arith.constant 0 : i32
    %c0_i32_0 = arith.constant 0 : i32
    %c0_i32_1 = arith.constant 0 : i32
    return %c0_i32, %c0_i32_0 : i32, i32
  }
  func.func @transform_5(%arg0: i32) -> (i32, i32) {
    %c0_i32 = arith.constant 0 : i32
    %c0_i32_0 = arith.constant 0 : i32
    %c0_i32_1 = arith.constant 0 : i32
    return %c0_i32, %c0_i32_0 : i32, i32
  }
  func.func @transform_6(%arg0: i32) -> (i32, i32) {
    %c0_i32 = arith.constant 0 : i32
    %c0_i32_0 = arith.constant 0 : i32
    %c0_i32_1 = arith.constant 0 : i32
    return %c0_i32, %c0_i32_0 : i32, i32
  }
  func.func @transform_7(%arg0: i32) -> (i32, i32) {
    %c0_i32 = arith.constant 0 : i32
    %c0_i32_0 = arith.constant 0 : i32
    %c0_i32_1 = arith.constant 0 : i32
    return %c0_i32, %c0_i32_0 : i32, i32
  }
  func.func @transform_8(%arg0: i32) -> (i32, i32) {
    %c0_i32 = arith.constant 0 : i32
    %c0_i32_0 = arith.constant 0 : i32
    return %arg0, %c0_i32 : i32, i32
  }
}

module attributes {stable_mosaic.version = 11 : i64} {
  func.func @_actor_kernel(%arg0: i32, %arg1: memref<1x1xf32, #tpu.memory_space<smem>>, %arg2: memref<8x11xf32, #tpu.memory_space<vmem>>, %arg3: memref<11x256xbf16, #tpu.memory_space<vmem>>, %arg4: memref<1x256xf32, #tpu.memory_space<vmem>>, %arg5: memref<256x256xbf16, #tpu.memory_space<vmem>>, %arg6: memref<1x256xf32, #tpu.memory_space<vmem>>, %arg7: memref<256x128xbf16, #tpu.memory_space<vmem>>, %arg8: memref<1x128xf32, #tpu.memory_space<vmem>>, %arg9: memref<8x128xbf16, #tpu.memory_space<vmem>>) attributes {dimension_semantics = [#tpu.dimension_semantics<parallel>], iteration_bounds = array<i64: 1>, scalar_prefetch = 0 : i64, scratch_operands = 0 : i64, tpu.core_type = #tpu.core_type<tc>, window_params = [{transform_indices = @transform_0, window_bounds = array<i64: 1, 1>}, {transform_indices = @transform_1, window_bounds = array<i64: 8, 11>}, {pipeline_mode = #tpu.pipeline_mode<synchronous>, transform_indices = @transform_2, window_bounds = array<i64: 11, 256>}, {pipeline_mode = #tpu.pipeline_mode<synchronous>, transform_indices = @transform_3, window_bounds = array<i64: 1, 256>}, {pipeline_mode = #tpu.pipeline_mode<synchronous>, transform_indices = @transform_4, window_bounds = array<i64: 256, 256>}, {pipeline_mode = #tpu.pipeline_mode<synchronous>, transform_indices = @transform_5, window_bounds = array<i64: 1, 256>}, {pipeline_mode = #tpu.pipeline_mode<synchronous>, transform_indices = @transform_6, window_bounds = array<i64: 256, 128>}, {pipeline_mode = #tpu.pipeline_mode<synchronous>, transform_indices = @transform_7, window_bounds = array<i64: 1, 128>}, {transform_indices = @transform_8, window_bounds = array<i64: 8, 128>}]} {
    %c0 = arith.constant 0 : index
    %c0_0 = arith.constant 0 : index
    %0 = memref.load %arg1[%c0, %c0_0] : memref<1x1xf32, #tpu.memory_space<smem>>
    %c0_1 = arith.constant 0 : index
    %c0_2 = arith.constant 0 : index
    %1 = vector.load %arg2[%c0_1, %c0_2] : memref<8x11xf32, #tpu.memory_space<vmem>>, vector<8x11xf32>
    %2 = arith.truncf %1 : vector<8x11xf32> to vector<8x11xbf16>
    %c0_3 = arith.constant 0 : index
    %c0_4 = arith.constant 0 : index
    %3 = vector.load %arg3[%c0_3, %c0_4] : memref<11x256xbf16, #tpu.memory_space<vmem>>, vector<11x256xbf16>
    %cst = arith.constant dense<0.000000e+00> : vector<8x256xf32>
    %4 = tpu.matmul %2, %3, %cst {dimension_numbers = #tpu.dot_dimension_numbers<[1], [0], [0], [1], [0, 0, 1, 1], [], []>} : vector<8x11xbf16>, vector<11x256xbf16>, vector<8x256xf32> -> vector<8x256xf32>
    %c0_5 = arith.constant 0 : index
    %c0_6 = arith.constant 0 : index
    %5 = vector.load %arg4[%c0_5, %c0_6] : memref<1x256xf32, #tpu.memory_space<vmem>>, vector<1x256xf32>
    %6 = vector.broadcast %5 : vector<1x256xf32> to vector<8x256xf32>
    %7 = arith.addf %4, %6 : vector<8x256xf32>
    %cst_7 = arith.constant 0.000000e+00 : f32
    %8 = vector.broadcast %cst_7 : f32 to vector<8x256xf32>
    %9 = arith.maximumf %7, %8 : vector<8x256xf32>
    %10 = arith.truncf %9 : vector<8x256xf32> to vector<8x256xbf16>
    %c0_8 = arith.constant 0 : index
    %c0_9 = arith.constant 0 : index
    %11 = vector.load %arg5[%c0_8, %c0_9] : memref<256x256xbf16, #tpu.memory_space<vmem>>, vector<256x256xbf16>
    %cst_10 = arith.constant dense<0.000000e+00> : vector<8x256xf32>
    %12 = tpu.matmul %10, %11, %cst_10 {dimension_numbers = #tpu.dot_dimension_numbers<[1], [0], [0], [1], [0, 0, 1, 1], [], []>} : vector<8x256xbf16>, vector<256x256xbf16>, vector<8x256xf32> -> vector<8x256xf32>
    %c0_11 = arith.constant 0 : index
    %c0_12 = arith.constant 0 : index
    %13 = vector.load %arg6[%c0_11, %c0_12] : memref<1x256xf32, #tpu.memory_space<vmem>>, vector<1x256xf32>
    %14 = vector.broadcast %13 : vector<1x256xf32> to vector<8x256xf32>
    %15 = arith.addf %12, %14 : vector<8x256xf32>
    %cst_13 = arith.constant 0.000000e+00 : f32
    %16 = vector.broadcast %cst_13 : f32 to vector<8x256xf32>
    %17 = arith.maximumf %15, %16 : vector<8x256xf32>
    %18 = arith.truncf %17 : vector<8x256xf32> to vector<8x256xbf16>
    %c0_14 = arith.constant 0 : index
    %c0_15 = arith.constant 0 : index
    %19 = vector.load %arg7[%c0_14, %c0_15] : memref<256x128xbf16, #tpu.memory_space<vmem>>, vector<256x128xbf16>
    %cst_16 = arith.constant dense<0.000000e+00> : vector<8x128xf32>
    %20 = tpu.matmul %18, %19, %cst_16 {dimension_numbers = #tpu.dot_dimension_numbers<[1], [0], [0], [1], [0, 0, 1, 1], [], []>} : vector<8x256xbf16>, vector<256x128xbf16>, vector<8x128xf32> -> vector<8x128xf32>
    %c0_17 = arith.constant 0 : index
    %c0_18 = arith.constant 0 : index
    %21 = vector.load %arg8[%c0_17, %c0_18] : memref<1x128xf32, #tpu.memory_space<vmem>>, vector<1x128xf32>
    %22 = vector.broadcast %21 : vector<1x128xf32> to vector<8x128xf32>
    %23 = arith.addf %20, %22 : vector<8x128xf32>
    %24 = math.tanh %23 : vector<8x128xf32>
    %25 = vector.broadcast %0 : f32 to vector<8x128xf32>
    %26 = arith.mulf %25, %24 : vector<8x128xf32>
    %27 = arith.truncf %26 : vector<8x128xf32> to vector<8x128xbf16>
    %c0_19 = arith.constant 0 : index
    %c0_20 = arith.constant 0 : index
    %28 = vector.load %arg9[%c0_19, %c0_20] : memref<8x128xbf16, #tpu.memory_space<vmem>>, vector<8x128xbf16>
    tpu.vector_store %arg9[%c0_19, %c0_20], %27 {strides = array<i32>} : memref<8x128xbf16, #tpu.memory_space<vmem>>, vector<8x128xbf16>,
    return
  }
  func.func @transform_0(%arg0: i32) -> (i32, i32) {
    %c0_i32 = arith.constant 0 : i32
    %c0_i32_0 = arith.constant 0 : i32
    %c0_i32_1 = arith.constant 0 : i32
    return %c0_i32, %c0_i32_0 : i32, i32
  }
  func.func @transform_1(%arg0: i32) -> (i32, i32) {
    %c0_i32 = arith.constant 0 : i32
    %c0_i32_0 = arith.constant 0 : i32
    return %arg0, %c0_i32 : i32, i32
  }
  func.func @transform_2(%arg0: i32) -> (i32, i32) {
    %c0_i32 = arith.constant 0 : i32
    %c0_i32_0 = arith.constant 0 : i32
    %c0_i32_1 = arith.constant 0 : i32
    return %c0_i32, %c0_i32_0 : i32, i32
  }
  func.func @transform_3(%arg0: i32) -> (i32, i32) {
    %c0_i32 = arith.constant 0 : i32
    %c0_i32_0 = arith.constant 0 : i32
    %c0_i32_1 = arith.constant 0 : i32
    return %c0_i32, %c0_i32_0 : i32, i32
  }
  func.func @transform_4(%arg0: i32) -> (i32, i32) {
    %c0_i32 = arith.constant 0 : i32
    %c0_i32_0 = arith.constant 0 : i32
    %c0_i32_1 = arith.constant 0 : i32
    return %c0_i32, %c0_i32_0 : i32, i32
  }
  func.func @transform_5(%arg0: i32) -> (i32, i32) {
    %c0_i32 = arith.constant 0 : i32
    %c0_i32_0 = arith.constant 0 : i32
    %c0_i32_1 = arith.constant 0 : i32
    return %c0_i32, %c0_i32_0 : i32, i32
  }
  func.func @transform_6(%arg0: i32) -> (i32, i32) {
    %c0_i32 = arith.constant 0 : i32
    %c0_i32_0 = arith.constant 0 : i32
    %c0_i32_1 = arith.constant 0 : i32
    return %c0_i32, %c0_i32_0 : i32, i32
  }
  func.func @transform_7(%arg0: i32) -> (i32, i32) {
    %c0_i32 = arith.constant 0 : i32
    %c0_i32_0 = arith.constant 0 : i32
    %c0_i32_1 = arith.constant 0 : i32
    return %c0_i32, %c0_i32_0 : i32, i32
  }
  func.func @transform_8(%arg0: i32) -> (i32, i32) {
    %c0_i32 = arith.constant 0 : i32
    %c0_i32_0 = arith.constant 0 : i32
    return %arg0, %c0_i32 : i32, i32
  }
}

</mosaic_0001>

<bundles_post_ra>
// kernel: tpu_custom_call.1
= control target key start
LH: loop header
LB: loop body
LE: loop exit
PB: predicated region body
PF: predicated region fallthrough
CT: control target
= control target key end

     0   :  { %14 = vsyncpa [#allocation4], 0  ;;  %s1021_s0 = inlined_call_operand.<no memory space> [shape: f32[1,1], index: 0, kind: input, shape index: {}]   ;;  %s1022_s1 = inlined_call_operand.hbm [shape: f32[8,11], index: 1, kind: input, shape index: {}]   ;;  %s1023_s2 = inlined_call_operand.hbm [shape: bf16[11,256], index: 2, kind: input, shape index: {}]   ;;  %s1024_s3 = inlined_call_operand.vmem [shape: f32[1,256], index: 3, kind: input, shape index: {}]   ;;  %s1025_s4 = inlined_call_operand.hbm [shape: bf16[256,256], index: 4, kind: input, shape index: {}]   ;;  %s1026_s5 = inlined_call_operand.vmem [shape: f32[1,256], index: 5, kind: input, shape index: {}]   ;;  %s1027_s6 = inlined_call_operand.hbm [shape: bf16[256,128], index: 6, kind: input, shape index: {}]   ;;  %s1028_s7 = inlined_call_operand.vmem [shape: f32[1,128], index: 7, kind: input, shape index: {}]   ;;  %s1029_s8 = inlined_call_operand.hbm [shape: bf16[8,128], index: 8, kind: output, shape index: {}]  }
   0x1   :  { %15 = vsyncpa [#allocation7], 0 }
   0x2   :  { %16 = vsyncpa [#allocation10], 0 }
   0x3   :  { %17 = vsyncpa [#allocation5], 0  ;;  %s887_s27 = smov [#allocation6]   ;;  %s769_s9 = scalar_lea.hbm %s1023_s2, 256 }
   0x4   :  { %s35_s28 = sshll.u32 %s887_s27, 4  ;;  %p770_p0 = scmp.ne.s32.totalorder %s1023_s2, %s769_s9  ;;  %s36_s28 = int_to_ptr.vmem [resolvable:$true] %s35_s28 }
   0x5   :  { %p773_p1 = scmp.lt.u32.totalorder %s769_s9, %s1023_s2 }
   0x7   :  { %p775_p2 = pnand %p773_p1, %p770_p0 }
   0x9   :  { %778 = shalt.err (!%p775_p2)
}
   0xa   :  { %s779_s14 = scalar_lea.vmem %s36_s28, 256  ;;  %p784_p4 = scmp.lt.s32.totalorder %s36_s28, %s36_s28 }
   0xb   :  { %p780_p3 = scmp.ne.s32.totalorder %s36_s28, %s779_s14  ;;  %p785_p5 = scmp.lt.s32.totalorder %s779_s14, %s779_s14 }
   0xd   :  { %p786_p6 = por %p785_p5, %p784_p4 }
   0xf   :  { %p787_p7 = pnand %p786_p6, %p780_p3 }
  0x11   :  { %790 = shalt.err (!%p787_p7)
}
  0x12   :  { %s888_s15 = smov 128   ;;  %s889_s16 = smov 8  }
  0x13   :  { %41 = dma.hbm_to_vmem [thread:$0]  %s1023_s2, 256, %s36_s28, [#allocation7], %s888_s15, %s888_s15, %s889_s16  }
  0x14   :  { %s890_s19 = smov [#allocation3]   ;;  %s891_s21 = smov [#allocation8]  }
  0x15   :  { %s26_s20 = sshll.u32 %s890_s19, 4  ;;  %s49_s22 = sshll.u32 %s891_s21, 4  ;;  %s27_s20 = int_to_ptr.vmem [resolvable:$true] %s26_s20  ;;  %s50_s22 = int_to_ptr.vmem [resolvable:$true] %s49_s22 }
  0x16   :  { %s791_s25 = scalar_lea.hbm %s1022_s1, 128 }
  0x17   :  { %p792_p8 = scmp.ne.s32.totalorder %s1022_s1, %s791_s25  ;;  %p795_p9 = scmp.lt.u32.totalorder %s791_s25, %s1022_s1 }
  0x19   :  { %p797_p10 = pnand %p795_p9, %p792_p8 }
  0x1b   :  { %800 = shalt.err (!%p797_p10)
}
  0x1c   :  { %s801_s2 = scalar_lea.vmem %s27_s20, 128  ;;  %p806_p12 = scmp.lt.s32.totalorder %s27_s20, %s27_s20 }
  0x1d   :  { %p802_p11 = scmp.ne.s32.totalorder %s27_s20, %s801_s2  ;;  %p807_p13 = scmp.lt.s32.totalorder %s801_s2, %s801_s2 }
  0x1f   :  { %p808_p0 = por %p807_p13, %p806_p12 }
  0x21   :  { %p809_p1 = pnand %p808_p0, %p802_p11 }
  0x23   :  { %812 = shalt.err (!%p809_p1)
}
  0x24   :  { %29 = dma.hbm_to_vmem [thread:$0]  %s1022_s1, 128, %s27_s20, [#allocation4]  }
  0x25   :  { %s813_s12 = scalar_lea.hbm %s1025_s4, 4096 }
  0x26   :  { %p814_p2 = scmp.ne.s32.totalorder %s1025_s4, %s813_s12  ;;  %p817_p3 = scmp.lt.u32.totalorder %s813_s12, %s1025_s4 }
  0x28   :  { %p819_p4 = pnand %p817_p3, %p814_p2 }
  0x2a   :  { %822 = shalt.err (!%p819_p4)
}
  0x2b   :  { %s823_s19 = scalar_lea.vmem %s50_s22, 4096  ;;  %p828_p6 = scmp.lt.s32.totalorder %s50_s22, %s50_s22 }
  0x2c   :  { %p824_p5 = scmp.ne.s32.totalorder %s50_s22, %s823_s19  ;;  %p829_p7 = scmp.lt.s32.totalorder %s823_s19, %s823_s19 }
  0x2e   :  { %p830_p8 = por %p829_p7, %p828_p6 }
  0x30   :  { %p831_p9 = pnand %p830_p8, %p824_p5 }
  0x32   :  { %834 = shalt.err (!%p831_p9)
}
  0x33   :  { %55 = dma.hbm_to_vmem [thread:$0]  %s1025_s4, 4096, %s50_s22, [#allocation7], %s888_s15, %s888_s15, %s889_s16  }
  0x34   :  { %s892_s21 = smov [#allocation9]   ;;  %s835_s26 = scalar_lea.hbm %s1027_s6, 2048 }
  0x35   :  { %s63_s23 = sshll.u32 %s892_s21, 4  ;;  %p836_p10 = scmp.ne.s32.totalorder %s1027_s6, %s835_s26  ;;  %s64_s23 = int_to_ptr.vmem [resolvable:$true] %s63_s23 }
  0x36   :  { %p839_p11 = scmp.lt.u32.totalorder %s835_s26, %s1027_s6 }
  0x38   :  { %p841_p12 = pnand %p839_p11, %p836_p10 }
  0x3a   :  { %844 = shalt.err (!%p841_p12)
}
  0x3b   :  { %s845_s28 = scalar_lea.vmem %s64_s23, 2048  ;;  %p850_p0 = scmp.lt.s32.totalorder %s64_s23, %s64_s23 }
  0x3c   :  { %p846_p13 = scmp.ne.s32.totalorder %s64_s23, %s845_s28  ;;  %p851_p1 = scmp.lt.s32.totalorder %s845_s28, %s845_s28 }
  0x3e   :  { %p852_p2 = por %p851_p1, %p850_p0 }
  0x40   :  { %p853_p3 = pnand %p852_p2, %p846_p13 }
  0x42   :  { %856 = shalt.err (!%p853_p3)
}
  0x43   :  { %s893_s4 = smov 64   ;;  %s894_s15 = smov 4  }
  0x44   :  { %69 = dma.hbm_to_vmem [thread:$0]  %s1027_s6, 2048, %s64_s23, [#allocation10], %s893_s4, %s893_s4, %s894_s15  }
  0x45   :  { %879 = dma.done.wait [#allocation4], 128  }
  0x46   :  { %880 = vsyncadd [#allocation4], 4294967168 }
  0x47   :  { %881 = dma.done.wait [#allocation7], 4352  }
  0x48   :  { %882 = vsyncadd [#allocation7], 4294962944 }
  0x49   :  { %883 = dma.done.wait [#allocation10], 2048  }
  0x4a   :  { %884 = vsyncadd [#allocation10], 4294965248  ;;  %vm114_vm0 = vcmask 1044480   ;;  %v895_v0 = vmov 0   ;;  %vm115_vm1 = vcmask 1045504   ;;  %v896_v1 = vmov 65535  }
  0x4b   :  { %156 = vmatprep.mubr.bf16.mxu0 %v895_v0  ;;  %v116_v2 = vsel %vm114_vm0, 4294967295, %v896_v1  ;;  %v700_v4 = vld [vmem:[#allocation6 + $0x4] ss:$8 sps:$4 sm:$0x3f]   ;;  %v86_v6 = vld [vmem:[#allocation3] sm:$0xff]  ;;  %vm110_vm2 = vcmask 89088   ;;  %v92_v54 = vlaneseq }
  0x4c   :  { %v117_v3 = vsel %vm115_vm1, %v116_v2, 0  ;;  %v702_v5 = vld [vmem:[#allocation6] ss:$8 sps:$4 sm:$0x3f]   ;;  %v703_v8 = vld [vmem:[#allocation8 + $0x4] ss:$8 sps:$4 sm:$0xff]   ;;  %v87_v12 = vpack.c.bf16 %v86_v6, %v86_v6 }
  0x4d   :  { %v122_v7 = vand.u32 %v700_v4, %v117_v3  ;;  %v705_v9 = vld [vmem:[#allocation8] ss:$8 sps:$4 sm:$0xff]   ;;  %v119_v10 = vand.u32 %v702_v5, %v117_v3  ;;  %v706_v11 = vld [vmem:[#allocation8 + $0x14] ss:$8 sps:$4 sm:$0xff]   ;;  %373 = vmatprep.subr.bf16.mxu1 %v703_v8  ;;  %v708_v13 = vld [vmem:[#allocation8 + $0x10] ss:$8 sps:$4 sm:$0xff]  }
  0x4e   :  { %374 = vmatpush1.bf16.msra.mxu1 %v705_v9  ;;  %v709_v14 = vld [vmem:[#allocation8 + $0x24] ss:$8 sps:$4 sm:$0xff]   ;;  %v711_v15 = vld [vmem:[#allocation8 + $0x20] ss:$8 sps:$4 sm:$0xff]   ;;  %v712_v16 = vld [vmem:[#allocation8 + $0x34] ss:$8 sps:$4 sm:$0xff]  }
  0x4f   :  { %124 = vmatprep.subr.bf16.mxu0 %v122_v7  ;;  %375 = vmatprep.subr.bf16.mxu1 %v706_v11  ;;  %v714_v17 = vld [vmem:[#allocation8 + $0x30] ss:$8 sps:$4 sm:$0xff]   ;;  %v715_v18 = vld [vmem:[#allocation8 + $0x44] ss:$8 sps:$4 sm:$0xff]   ;;  %v717_v19 = vld [vmem:[#allocation8 + $0x40] ss:$8 sps:$4 sm:$0xff]  }
  0x50   :  { %125 = vmatpush1.bf16.msra.mxu0 %v119_v10  ;;  %v718_v20 = vld [vmem:[#allocation8 + $0x54] ss:$8 sps:$4 sm:$0xff]   ;;  %v720_v21 = vld [vmem:[#allocation8 + $0x50] ss:$8 sps:$4 sm:$0xff]   ;;  %v721_v22 = vld [vmem:[#allocation8 + $0x64] ss:$8 sps:$4 sm:$0xff]  }
  0x51   :  { %v723_v23 = vld [vmem:[#allocation8 + $0x60] ss:$8 sps:$4 sm:$0xff]   ;;  %v724_v24 = vld [vmem:[#allocation8 + $0x74] ss:$8 sps:$4 sm:$0xff]   ;;  %v726_v25 = vld [vmem:[#allocation8 + $0x70] ss:$8 sps:$4 sm:$0xff]  }
  0x52   :  { %376 = vmatpush1.bf16.msra.mxu1 %v708_v13  ;;  %v727_v26 = vld [vmem:[#allocation8 + $0x84] ss:$8 sps:$4 sm:$0xff]   ;;  %v729_v27 = vld [vmem:[#allocation8 + $0x80] ss:$8 sps:$4 sm:$0xff]   ;;  %v730_v28 = vld [vmem:[#allocation8 + $0x94] ss:$8 sps:$4 sm:$0xff]  }
  0x53   :  { %617 = vmatmul.mubr.msk.bf16.vlgmr.msra.gmra.mrb[0].mxu0 %vm110_vm2, %v87_v12  ;;  %377 = vmatprep.subr.bf16.mxu1 %v709_v14  ;;  %v732_v29 = vld [vmem:[#allocation8 + $0x90] ss:$8 sps:$4 sm:$0xff]   ;;  %v733_v30 = vld [vmem:[#allocation8 + $0xa4] ss:$8 sps:$4 sm:$0xff]   ;;  %v735_v31 = vld [vmem:[#allocation8 + $0xa0] ss:$8 sps:$4 sm:$0xff]  }
  0x54   :  { %v736_v32 = vld [vmem:[#allocation8 + $0xb4] ss:$8 sps:$4 sm:$0xff]   ;;  %v738_v33 = vld [vmem:[#allocation8 + $0xb0] ss:$8 sps:$4 sm:$0xff]   ;;  %v739_v34 = vld [vmem:[#allocation8 + $0xc4] ss:$8 sps:$4 sm:$0xff]  }
  0x55   :  { %v741_v35 = vld [vmem:[#allocation8 + $0xc0] ss:$8 sps:$4 sm:$0xff]   ;;  %v742_v36 = vld [vmem:[#allocation8 + $0xd4] ss:$8 sps:$4 sm:$0xff]   ;;  %v744_v37 = vld [vmem:[#allocation8 + $0xd0] ss:$8 sps:$4 sm:$0xff]  }
  0x56   :  { %378 = vmatpush1.bf16.msra.mxu1 %v711_v15  ;;  %v745_v38 = vld [vmem:[#allocation8 + $0xe4] ss:$8 sps:$4 sm:$0xff]   ;;  %v747_v39 = vld [vmem:[#allocation8 + $0xe0] ss:$8 sps:$4 sm:$0xff]   ;;  %v748_v40 = vld [vmem:[#allocation8 + $0xf4] ss:$8 sps:$4 sm:$0xff]  }
  0x57   :  { %379 = vmatprep.subr.bf16.mxu1 %v712_v16  ;;  %v750_v41 = vld [vmem:[#allocation8 + $0xf0] ss:$8 sps:$4 sm:$0xff]   ;;  %v751_v42 = vld [vmem:[#allocation9 + $0x40] sm:$0xff]   ;;  %v753_v44 = vld [vmem:[#allocation9 + $0x48] sm:$0xff]   ;;  %v93_v55 = vshrl.u32 %v92_v54, 7  ;;  %s897_s14 = smov [#allocation11]  }
  0x58   :  { %v752_v43 = vld [vmem:[#allocation9] sm:$0xff]   ;;  %667 = vmatprep.subr.bf16.mxu0 %v751_v42  ;;  %v754_v45 = vld [vmem:[#allocation9 + $0x8] sm:$0xff]   ;;  %v755_v46 = vld [vmem:[#allocation9 + $0x50] sm:$0xff]   ;;  %s604_s17 = sshll.u32 %s897_s14, 4  ;;  %s605_s17 = int_to_ptr.vmem [resolvable:$true] %s604_s17 }
  0x59   :  { %668 = vmatpush3.bf16.msra.mxu0 %v752_v43  ;;  %v756_v47 = vld [vmem:[#allocation9 + $0x10] sm:$0xff]   ;;  %v757_v48 = vld [vmem:[#allocation9 + $0x58] sm:$0xff]   ;;  %v759_v50 = vld [vmem:[#allocation9 + $0x60] sm:$0xff]   ;;  %v94_v56 = vsub.s32 0, %v93_v55  ;;  %v98_v58 = vsub.s32 1, %v93_v55  ;;  %s857_s18 = scalar_lea.vmem %s605_s17, 64  ;;  %p862_p5 = scmp.lt.s32.totalorder %s605_s17, %s605_s17 }
  0x5a   :  { %380 = vmatpush1.bf16.msra.mxu1 %v714_v17  ;;  %669 = vmatprep.subr.bf16.mxu0 %v753_v44  ;;  %v758_v49 = vld [vmem:[#allocation9 + $0x18] sm:$0xff]   ;;  %v760_v51 = vld [vmem:[#allocation9 + $0x20] sm:$0xff]   ;;  %v761_v52 = vld [vmem:[#allocation9 + $0x68] sm:$0xff]   ;;  %p858_p4 = scmp.ne.s32.totalorder %s605_s17, %s857_s18  ;;  %p863_p6 = scmp.lt.s32.totalorder %s857_s18, %s857_s18 }
  0x5b   :  { %381 = vmatprep.subr.bf16.mxu1 %v715_v18  ;;  %v762_v53 = vld [vmem:[#allocation9 + $0x28] sm:$0xff]   ;;  %v763_v7 = vld [vmem:[#allocation9 + $0x70] sm:$0xff]   ;;  %v765_v9 = vld [vmem:[#allocation9 + $0x78] sm:$0xff]  }
  0x5c   :  { %v90_v57 = vld [vmem:[%s1024_s3] sm:$0x3]  ;;  %v764_v8 = vld [vmem:[#allocation9 + $0x30] sm:$0xff]   ;;  %v766_v10 = vld [vmem:[#allocation9 + $0x38] sm:$0xff]   ;;  %p864_p7 = por %p863_p6, %p862_p5 }
  0x5d   :  { %670 = vmatpush3.bf16.msra.mxu0 %v754_v45  ;;  %v95_v59 = vrot.slane %v90_v57, %v94_v56  ;;  %v99_v60 = vrot.slane %v90_v57, %v98_v58  ;;  %v201_v11 = vld [vmem:[%s1026_s5] sm:$0x3] }
  0x5e   :  { %382 = vmatpush1.bf16.msra.mxu1 %v717_v19  ;;  %671 = vmatprep.subr.bf16.mxu0 %v755_v46  ;;  %v206_v12 = vrot.slane %v201_v11, %v94_v56  ;;  %v210_v13 = vrot.slane %v201_v11, %v98_v58  ;;  %p865_p8 = pnand %p864_p7, %p858_p4 }
  0x5f   :  { %383 = vmatprep.subr.bf16.mxu1 %v718_v20 }
  0x61   :  { %672 = vmatpush3.bf16.msra.mxu0 %v756_v47 }
  0x62   :  { %384 = vmatpush1.bf16.msra.mxu1 %v720_v21  ;;  %673 = vmatprep.subr.bf16.mxu0 %v757_v48 }
  0x63   :  { %385 = vmatprep.subr.bf16.mxu1 %v721_v22 }
  0x65   :  { %674 = vmatpush3.bf16.msra.mxu0 %v758_v49 }
  0x66   :  { %386 = vmatpush1.bf16.msra.mxu1 %v723_v23  ;;  %675 = vmatprep.subr.bf16.mxu0 %v759_v50 }
  0x67   :  { %387 = vmatprep.subr.bf16.mxu1 %v724_v24 }
  0x69   :  { %676 = vmatpush3.bf16.msra.mxu0 %v760_v51 }
  0x6a   :  { %388 = vmatpush1.bf16.msra.mxu1 %v726_v25  ;;  %677 = vmatprep.subr.bf16.mxu0 %v761_v52  ;;  %v650_v25 = vld [vmem:[%s1028_s7] ss:$0 sm:$0xff] }
  0x6b   :  { %389 = vmatprep.subr.bf16.mxu1 %v727_v26 }
  0x6d   :  { %678 = vmatpush3.bf16.msra.mxu0 %v762_v53 }
  0x6e   :  { %390 = vmatpush1.bf16.msra.mxu1 %v729_v27  ;;  %679 = vmatprep.subr.bf16.mxu0 %v763_v7 }
  0x6f   :  { %391 = vmatprep.subr.bf16.mxu1 %v730_v28 }
  0x71   :  { %680 = vmatpush3.bf16.msra.mxu0 %v764_v8 }
  0x72   :  { %392 = vmatpush1.bf16.msra.mxu1 %v732_v29  ;;  %681 = vmatprep.subr.bf16.mxu0 %v765_v9 }
  0x73   :  { %393 = vmatprep.subr.bf16.mxu1 %v733_v30 }
  0x75   :  { %682 = vmatpush3.bf16.msra.mxu0 %v766_v10 }
  0x76   :  { %394 = vmatpush1.bf16.msra.mxu1 %v735_v31  ;;  %v594_v31 = vstv %s1021_s0 }
  0x77   :  { %395 = vmatprep.subr.bf16.mxu1 %v736_v32 }
  0x7a   :  { %396 = vmatpush1.bf16.msra.mxu1 %v738_v33 }
  0x7b   :  { %397 = vmatprep.subr.bf16.mxu1 %v739_v34 }
  0x7e   :  { %398 = vmatpush1.bf16.msra.mxu1 %v741_v35 }
  0x7f   :  { %399 = vmatprep.subr.bf16.mxu1 %v742_v36 }
  0x82   :  { %400 = vmatpush1.bf16.msra.mxu1 %v744_v37 }
  0x83   :  { %401 = vmatprep.subr.bf16.mxu1 %v745_v38 }
  0x86   :  { %402 = vmatpush1.bf16.msra.mxu1 %v747_v39 }
  0x87   :  { %403 = vmatprep.subr.bf16.mxu1 %v748_v40 }
  0x8a   :  { %404 = vmatpush1.bf16.msra.mxu1 %v750_v41 }
 0x126   :  { %v158_v61 = vpop.f32.mrb[0].mxu0 }
 0x127   :  { %v159_v62 = vadd.f32 %v158_v61, %v95_v59  ;;  %v160_v63 = vpop.f32.mrb[1].mxu0 }
 0x128   :  { %v161_v0 = vadd.f32 %v160_v63, %v99_v60  ;;  %v162_v1 = vpop.f32.mrb[2].mxu0 }
 0x129   :  { %v165_v2 = vmax.f32 %v159_v62, 0.0  ;;  %v163_v3 = vpop.f32.mrb[3].mxu0 }
 0x12a   :  { %v166_v4 = vmax.f32 %v161_v0, 0.0 }
 0x12b   :  { %v167_v6 = vpack.c.bf16 %v165_v2, %v165_v2 }
 0x12c   :  { %v168_v5 = vpack.c.bf16 %v166_v4, %v166_v4 }
 0x12e   :  { %405 = vmatprep.mubr.bf16.mxu1 %v168_v5 }
 0x12f   :  { %406 = vmatmul.mubr.bf16.vlgmr.msra.gmra.mrb[0].mxu1 %v167_v6 }
 0x202   :  { %v407_v14 = vpop.f32.mrb[0].mxu1 }
 0x203   :  { %v408_v15 = vadd.f32 %v407_v14, %v206_v12  ;;  %v409_v16 = vpop.f32.mrb[1].mxu1 }
 0x204   :  { %v410_v17 = vadd.f32 %v409_v16, %v210_v13  ;;  %v411_v18 = vpop.f32.mrb[2].mxu1 }
 0x205   :  { %v414_v19 = vmax.f32 %v408_v15, 0.0  ;;  %v412_v20 = vpop.f32.mrb[3].mxu1 }
 0x206   :  { %v415_v21 = vmax.f32 %v410_v17, 0.0 }
 0x207   :  { %v416_v23 = vpack.c.bf16 %v414_v19, %v414_v19 }
 0x208   :  { %v417_v22 = vpack.c.bf16 %v415_v21, %v415_v21 }
 0x20a   :  { %585 = vmatprep.mubr.bf16.mxu0 %v417_v22 }
 0x20b   :  { %586 = vmatmul.mubr.bf16.vlgmr.msra.gmra.mrb[4].mxu0 %v416_v23 }
 0x2de   :  { %v683_v24 = vpop.f32.mrb[4].mxu0 }
 0x2df   :  { %v684_v26 = vpop.f32.mrb[5].mxu0 }
 0x2e0   :  { %v685_v27 = vadd.f32 %v684_v26, %v683_v24  ;;  %v686_v28 = vpop.f32.mrb[6].mxu0 }
 0x2e1   :  { %v687_v29 = vpop.f32.mrb[7].mxu0 }
 0x2e2   :  { %v588_v30 = vadd.f32 %v685_v27, %v650_v25 }
 0x2e4   :  { %767 = vtanh.f32 %v588_v30 }
 0x2ee   :  { %v768_v32 = vpop.eup %767 }
 0x2ef   :  { %v595_v33 = vmul.f32 %v768_v32, %v594_v31 }
 0x2f1   :  { %v596_v34 = vpack.c.bf16 %v595_v33, %v595_v33 }
 0x2f3   :  { %597 = vst [vmem:[#allocation11] sm:$0xf] %v596_v34 }
 0x2f4   :  { %868 = shalt.err (!%p865_p8)
}
 0x2f5   :  { %s869_s1 = scalar_lea.hbm %s1029_s8, 64 }
 0x2f6   :  { %p870_p9 = scmp.ne.s32.totalorder %s1029_s8, %s869_s1  ;;  %p873_p10 = scmp.lt.u32.totalorder %s869_s1, %s1029_s8 }
 0x2f8   :  { %p875_p11 = pnand %p873_p10, %p870_p9 }
 0x2fa   :  { %878 = shalt.err (!%p875_p11)
}
 0x2fb   :  { %607 = dma.vmem_to_hbm [thread:$0]  %s605_s17, 64, %s1029_s8, [#allocation5]  }
 0x2fc   :  { %885 = dma.done.wait [#allocation5], 64  }
 0x2fd   :  { %886 = vsyncadd [#allocation5], 4294967232 }
 0x2fe   :  { %611 = vsyncpa [#allocation4], 1 }
 0x2ff   :  { %612 = vsyncpa [#allocation7], 1 }
 0x300   :  { %613 = vsyncpa [#allocation10], 1 }
 0x301   :  { %614 = vsyncpa [#allocation5], 1 }

// kernel: tpu_custom_call.1
= control target key start
LH: loop header
LB: loop body
LE: loop exit
PB: predicated region body
PF: predicated region fallthrough
CT: control target
= control target key end

     0   :  { %14 = vsyncpa [#allocation4], 0  ;;  %s1021_s0 = inlined_call_operand.<no memory space> [shape: f32[1,1], index: 0, kind: input, shape index: {}]   ;;  %s1022_s1 = inlined_call_operand.hbm [shape: f32[8,11], index: 1, kind: input, shape index: {}]   ;;  %s1023_s2 = inlined_call_operand.hbm [shape: bf16[11,256], index: 2, kind: input, shape index: {}]   ;;  %s1024_s3 = inlined_call_operand.vmem [shape: f32[1,256], index: 3, kind: input, shape index: {}]   ;;  %s1025_s4 = inlined_call_operand.hbm [shape: bf16[256,256], index: 4, kind: input, shape index: {}]   ;;  %s1026_s5 = inlined_call_operand.vmem [shape: f32[1,256], index: 5, kind: input, shape index: {}]   ;;  %s1027_s6 = inlined_call_operand.hbm [shape: bf16[256,128], index: 6, kind: input, shape index: {}]   ;;  %s1028_s7 = inlined_call_operand.vmem [shape: f32[1,128], index: 7, kind: input, shape index: {}]   ;;  %s1029_s8 = inlined_call_operand.hbm [shape: bf16[8,128], index: 8, kind: output, shape index: {}]  }
   0x1   :  { %15 = vsyncpa [#allocation7], 0 }
   0x2   :  { %16 = vsyncpa [#allocation10], 0 }
   0x3   :  { %17 = vsyncpa [#allocation5], 0  ;;  %s887_s27 = smov [#allocation6]   ;;  %s769_s9 = scalar_lea.hbm %s1023_s2, 256 }
   0x4   :  { %s35_s28 = sshll.u32 %s887_s27, 4  ;;  %p770_p0 = scmp.ne.s32.totalorder %s1023_s2, %s769_s9  ;;  %s36_s28 = int_to_ptr.vmem [resolvable:$true] %s35_s28 }
   0x5   :  { %p773_p1 = scmp.lt.u32.totalorder %s769_s9, %s1023_s2 }
   0x7   :  { %p775_p2 = pnand %p773_p1, %p770_p0 }
   0x9   :  { %778 = shalt.err (!%p775_p2)
}
   0xa   :  { %s779_s14 = scalar_lea.vmem %s36_s28, 256  ;;  %p784_p4 = scmp.lt.s32.totalorder %s36_s28, %s36_s28 }
   0xb   :  { %p780_p3 = scmp.ne.s32.totalorder %s36_s28, %s779_s14  ;;  %p785_p5 = scmp.lt.s32.totalorder %s779_s14, %s779_s14 }
   0xd   :  { %p786_p6 = por %p785_p5, %p784_p4 }
   0xf   :  { %p787_p7 = pnand %p786_p6, %p780_p3 }
  0x11   :  { %790 = shalt.err (!%p787_p7)
}
  0x12   :  { %s888_s15 = smov 128   ;;  %s889_s16 = smov 8  }
  0x13   :  { %41 = dma.hbm_to_vmem [thread:$0]  %s1023_s2, 256, %s36_s28, [#allocation7], %s888_s15, %s888_s15, %s889_s16  }
  0x14   :  { %s890_s19 = smov [#allocation3]   ;;  %s891_s21 = smov [#allocation8]  }
  0x15   :  { %s26_s20 = sshll.u32 %s890_s19, 4  ;;  %s49_s22 = sshll.u32 %s891_s21, 4  ;;  %s27_s20 = int_to_ptr.vmem [resolvable:$true] %s26_s20  ;;  %s50_s22 = int_to_ptr.vmem [resolvable:$true] %s49_s22 }
  0x16   :  { %s791_s25 = scalar_lea.hbm %s1022_s1, 128 }
  0x17   :  { %p792_p8 = scmp.ne.s32.totalorder %s1022_s1, %s791_s25  ;;  %p795_p9 = scmp.lt.u32.totalorder %s791_s25, %s1022_s1 }
  0x19   :  { %p797_p10 = pnand %p795_p9, %p792_p8 }
  0x1b   :  { %800 = shalt.err (!%p797_p10)
}
  0x1c   :  { %s801_s2 = scalar_lea.vmem %s27_s20, 128  ;;  %p806_p12 = scmp.lt.s32.totalorder %s27_s20, %s27_s20 }
  0x1d   :  { %p802_p11 = scmp.ne.s32.totalorder %s27_s20, %s801_s2  ;;  %p807_p13 = scmp.lt.s32.totalorder %s801_s2, %s801_s2 }
  0x1f   :  { %p808_p0 = por %p807_p13, %p806_p12 }
  0x21   :  { %p809_p1 = pnand %p808_p0, %p802_p11 }
  0x23   :  { %812 = shalt.err (!%p809_p1)
}
  0x24   :  { %29 = dma.hbm_to_vmem [thread:$0]  %s1022_s1, 128, %s27_s20, [#allocation4]  }
  0x25   :  { %s813_s12 = scalar_lea.hbm %s1025_s4, 4096 }
  0x26   :  { %p814_p2 = scmp.ne.s32.totalorder %s1025_s4, %s813_s12  ;;  %p817_p3 = scmp.lt.u32.totalorder %s813_s12, %s1025_s4 }
  0x28   :  { %p819_p4 = pnand %p817_p3, %p814_p2 }
  0x2a   :  { %822 = shalt.err (!%p819_p4)
}
  0x2b   :  { %s823_s19 = scalar_lea.vmem %s50_s22, 4096  ;;  %p828_p6 = scmp.lt.s32.totalorder %s50_s22, %s50_s22 }
  0x2c   :  { %p824_p5 = scmp.ne.s32.totalorder %s50_s22, %s823_s19  ;;  %p829_p7 = scmp.lt.s32.totalorder %s823_s19, %s823_s19 }
  0x2e   :  { %p830_p8 = por %p829_p7, %p828_p6 }
  0x30   :  { %p831_p9 = pnand %p830_p8, %p824_p5 }
  0x32   :  { %834 = shalt.err (!%p831_p9)
}
  0x33   :  { %55 = dma.hbm_to_vmem [thread:$0]  %s1025_s4, 4096, %s50_s22, [#allocation7], %s888_s15, %s888_s15, %s889_s16  }
  0x34   :  { %s892_s21 = smov [#allocation9]   ;;  %s835_s26 = scalar_lea.hbm %s1027_s6, 2048 }
  0x35   :  { %s63_s23 = sshll.u32 %s892_s21, 4  ;;  %p836_p10 = scmp.ne.s32.totalorder %s1027_s6, %s835_s26  ;;  %s64_s23 = int_to_ptr.vmem [resolvable:$true] %s63_s23 }
  0x36   :  { %p839_p11 = scmp.lt.u32.totalorder %s835_s26, %s1027_s6 }
  0x38   :  { %p841_p12 = pnand %p839_p11, %p836_p10 }
  0x3a   :  { %844 = shalt.err (!%p841_p12)
}
  0x3b   :  { %s845_s28 = scalar_lea.vmem %s64_s23, 2048  ;;  %p850_p0 = scmp.lt.s32.totalorder %s64_s23, %s64_s23 }
  0x3c   :  { %p846_p13 = scmp.ne.s32.totalorder %s64_s23, %s845_s28  ;;  %p851_p1 = scmp.lt.s32.totalorder %s845_s28, %s845_s28 }
  0x3e   :  { %p852_p2 = por %p851_p1, %p850_p0 }
  0x40   :  { %p853_p3 = pnand %p852_p2, %p846_p13 }
  0x42   :  { %856 = shalt.err (!%p853_p3)
}
  0x43   :  { %s893_s4 = smov 64   ;;  %s894_s15 = smov 4  }
  0x44   :  { %69 = dma.hbm_to_vmem [thread:$0]  %s1027_s6, 2048, %s64_s23, [#allocation10], %s893_s4, %s893_s4, %s894_s15  }
  0x45   :  { %879 = dma.done.wait [#allocation4], 128  }
  0x46   :  { %880 = vsyncadd [#allocation4], 4294967168 }
  0x47   :  { %881 = dma.done.wait [#allocation7], 4352  }
  0x48   :  { %882 = vsyncadd [#allocation7], 4294962944 }
  0x49   :  { %883 = dma.done.wait [#allocation10], 2048  }
  0x4a   :  { %884 = vsyncadd [#allocation10], 4294965248  ;;  %vm114_vm0 = vcmask 1044480   ;;  %v895_v0 = vmov 0   ;;  %vm115_vm1 = vcmask 1045504   ;;  %v896_v1 = vmov 65535  }
  0x4b   :  { %156 = vmatprep.mubr.bf16.mxu0 %v895_v0  ;;  %v116_v2 = vsel %vm114_vm0, 4294967295, %v896_v1  ;;  %v700_v4 = vld [vmem:[#allocation6 + $0x4] ss:$8 sps:$4 sm:$0x3f]   ;;  %v86_v6 = vld [vmem:[#allocation3] sm:$0xff]  ;;  %vm110_vm2 = vcmask 89088   ;;  %v92_v54 = vlaneseq }
  0x4c   :  { %v117_v3 = vsel %vm115_vm1, %v116_v2, 0  ;;  %v702_v5 = vld [vmem:[#allocation6] ss:$8 sps:$4 sm:$0x3f]   ;;  %v703_v8 = vld [vmem:[#allocation8 + $0x4] ss:$8 sps:$4 sm:$0xff]   ;;  %v87_v12 = vpack.c.bf16 %v86_v6, %v86_v6 }
  0x4d   :  { %v122_v7 = vand.u32 %v700_v4, %v117_v3  ;;  %v705_v9 = vld [vmem:[#allocation8] ss:$8 sps:$4 sm:$0xff]   ;;  %v119_v10 = vand.u32 %v702_v5, %v117_v3  ;;  %v706_v11 = vld [vmem:[#allocation8 + $0x14] ss:$8 sps:$4 sm:$0xff]   ;;  %373 = vmatprep.subr.bf16.mxu1 %v703_v8  ;;  %v708_v13 = vld [vmem:[#allocation8 + $0x10] ss:$8 sps:$4 sm:$0xff]  }
  0x4e   :  { %374 = vmatpush1.bf16.msra.mxu1 %v705_v9  ;;  %v709_v14 = vld [vmem:[#allocation8 + $0x24] ss:$8 sps:$4 sm:$0xff]   ;;  %v711_v15 = vld [vmem:[#allocation8 + $0x20] ss:$8 sps:$4 sm:$0xff]   ;;  %v712_v16 = vld [vmem:[#allocation8 + $0x34] ss:$8 sps:$4 sm:$0xff]  }
  0x4f   :  { %124 = vmatprep.subr.bf16.mxu0 %v122_v7  ;;  %375 = vmatprep.subr.bf16.mxu1 %v706_v11  ;;  %v714_v17 = vld [vmem:[#allocation8 + $0x30] ss:$8 sps:$4 sm:$0xff]   ;;  %v715_v18 = vld [vmem:[#allocation8 + $0x44] ss:$8 sps:$4 sm:$0xff]   ;;  %v717_v19 = vld [vmem:[#allocation8 + $0x40] ss:$8 sps:$4 sm:$0xff]  }
  0x50   :  { %125 = vmatpush1.bf16.msra.mxu0 %v119_v10  ;;  %v718_v20 = vld [vmem:[#allocation8 + $0x54] ss:$8 sps:$4 sm:$0xff]   ;;  %v720_v21 = vld [vmem:[#allocation8 + $0x50] ss:$8 sps:$4 sm:$0xff]   ;;  %v721_v22 = vld [vmem:[#allocation8 + $0x64] ss:$8 sps:$4 sm:$0xff]  }
  0x51   :  { %v723_v23 = vld [vmem:[#allocation8 + $0x60] ss:$8 sps:$4 sm:$0xff]   ;;  %v724_v24 = vld [vmem:[#allocation8 + $0x74] ss:$8 sps:$4 sm:$0xff]   ;;  %v726_v25 = vld [vmem:[#allocation8 + $0x70] ss:$8 sps:$4 sm:$0xff]  }
  0x52   :  { %376 = vmatpush1.bf16.msra.mxu1 %v708_v13  ;;  %v727_v26 = vld [vmem:[#allocation8 + $0x84] ss:$8 sps:$4 sm:$0xff]   ;;  %v729_v27 = vld [vmem:[#allocation8 + $0x80] ss:$8 sps:$4 sm:$0xff]   ;;  %v730_v28 = vld [vmem:[#allocation8 + $0x94] ss:$8 sps:$4 sm:$0xff]  }
  0x53   :  { %617 = vmatmul.mubr.msk.bf16.vlgmr.msra.gmra.mrb[0].mxu0 %vm110_vm2, %v87_v12  ;;  %377 = vmatprep.subr.bf16.mxu1 %v709_v14  ;;  %v732_v29 = vld [vmem:[#allocation8 + $0x90] ss:$8 sps:$4 sm:$0xff]   ;;  %v733_v30 = vld [vmem:[#allocation8 + $0xa4] ss:$8 sps:$4 sm:$0xff]   ;;  %v735_v31 = vld [vmem:[#allocation8 + $0xa0] ss:$8 sps:$4 sm:$0xff]  }
  0x54   :  { %v736_v32 = vld [vmem:[#allocation8 + $0xb4] ss:$8 sps:$4 sm:$0xff]   ;;  %v738_v33 = vld [vmem:[#allocation8 + $0xb0] ss:$8 sps:$4 sm:$0xff]   ;;  %v739_v34 = vld [vmem:[#allocation8 + $0xc4] ss:$8 sps:$4 sm:$0xff]  }
  0x55   :  { %v741_v35 = vld [vmem:[#allocation8 + $0xc0] ss:$8 sps:$4 sm:$0xff]   ;;  %v742_v36 = vld [vmem:[#allocation8 + $0xd4] ss:$8 sps:$4 sm:$0xff]   ;;  %v744_v37 = vld [vmem:[#allocation8 + $0xd0] ss:$8 sps:$4 sm:$0xff]  }
  0x56   :  { %378 = vmatpush1.bf16.msra.mxu1 %v711_v15  ;;  %v745_v38 = vld [vmem:[#allocation8 + $0xe4] ss:$8 sps:$4 sm:$0xff]   ;;  %v747_v39 = vld [vmem:[#allocation8 + $0xe0] ss:$8 sps:$4 sm:$0xff]   ;;  %v748_v40 = vld [vmem:[#allocation8 + $0xf4] ss:$8 sps:$4 sm:$0xff]  }
  0x57   :  { %379 = vmatprep.subr.bf16.mxu1 %v712_v16  ;;  %v750_v41 = vld [vmem:[#allocation8 + $0xf0] ss:$8 sps:$4 sm:$0xff]   ;;  %v751_v42 = vld [vmem:[#allocation9 + $0x40] sm:$0xff]   ;;  %v753_v44 = vld [vmem:[#allocation9 + $0x48] sm:$0xff]   ;;  %v93_v55 = vshrl.u32 %v92_v54, 7  ;;  %s897_s14 = smov [#allocation11]  }
  0x58   :  { %v752_v43 = vld [vmem:[#allocation9] sm:$0xff]   ;;  %667 = vmatprep.subr.bf16.mxu0 %v751_v42  ;;  %v754_v45 = vld [vmem:[#allocation9 + $0x8] sm:$0xff]   ;;  %v755_v46 = vld [vmem:[#allocation9 + $0x50] sm:$0xff]   ;;  %s604_s17 = sshll.u32 %s897_s14, 4  ;;  %s605_s17 = int_to_ptr.vmem [resolvable:$true] %s604_s17 }
  0x59   :  { %668 = vmatpush3.bf16.msra.mxu0 %v752_v43  ;;  %v756_v47 = vld [vmem:[#allocation9 + $0x10] sm:$0xff]   ;;  %v757_v48 = vld [vmem:[#allocation9 + $0x58] sm:$0xff]   ;;  %v759_v50 = vld [vmem:[#allocation9 + $0x60] sm:$0xff]   ;;  %v94_v56 = vsub.s32 0, %v93_v55  ;;  %v98_v58 = vsub.s32 1, %v93_v55  ;;  %s857_s18 = scalar_lea.vmem %s605_s17, 64  ;;  %p862_p5 = scmp.lt.s32.totalorder %s605_s17, %s605_s17 }
  0x5a   :  { %380 = vmatpush1.bf16.msra.mxu1 %v714_v17  ;;  %669 = vmatprep.subr.bf16.mxu0 %v753_v44  ;;  %v758_v49 = vld [vmem:[#allocation9 + $0x18] sm:$0xff]   ;;  %v760_v51 = vld [vmem:[#allocation9 + $0x20] sm:$0xff]   ;;  %v761_v52 = vld [vmem:[#allocation9 + $0x68] sm:$0xff]   ;;  %p858_p4 = scmp.ne.s32.totalorder %s605_s17, %s857_s18  ;;  %p863_p6 = scmp.lt.s32.totalorder %s857_s18, %s857_s18 }
  0x5b   :  { %381 = vmatprep.subr.bf16.mxu1 %v715_v18  ;;  %v762_v53 = vld [vmem:[#allocation9 + $0x28] sm:$0xff]   ;;  %v763_v7 = vld [vmem:[#allocation9 + $0x70] sm:$0xff]   ;;  %v765_v9 = vld [vmem:[#allocation9 + $0x78] sm:$0xff]  }
  0x5c   :  { %v90_v57 = vld [vmem:[%s1024_s3] sm:$0x3]  ;;  %v764_v8 = vld [vmem:[#allocation9 + $0x30] sm:$0xff]   ;;  %v766_v10 = vld [vmem:[#allocation9 + $0x38] sm:$0xff]   ;;  %p864_p7 = por %p863_p6, %p862_p5 }
  0x5d   :  { %670 = vmatpush3.bf16.msra.mxu0 %v754_v45  ;;  %v95_v59 = vrot.slane %v90_v57, %v94_v56  ;;  %v99_v60 = vrot.slane %v90_v57, %v98_v58  ;;  %v201_v11 = vld [vmem:[%s1026_s5] sm:$0x3] }
  0x5e   :  { %382 = vmatpush1.bf16.msra.mxu1 %v717_v19  ;;  %671 = vmatprep.subr.bf16.mxu0 %v755_v46  ;;  %v206_v12 = vrot.slane %v201_v11, %v94_v56  ;;  %v210_v13 = vrot.slane %v201_v11, %v98_v58  ;;  %p865_p8 = pnand %p864_p7, %p858_p4 }
  0x5f   :  { %383 = vmatprep.subr.bf16.mxu1 %v718_v20 }
  0x61   :  { %672 = vmatpush3.bf16.msra.mxu0 %v756_v47 }
  0x62   :  { %384 = vmatpush1.bf16.msra.mxu1 %v720_v21  ;;  %673 = vmatprep.subr.bf16.mxu0 %v757_v48 }
  0x63   :  { %385 = vmatprep.subr.bf16.mxu1 %v721_v22 }
  0x65   :  { %674 = vmatpush3.bf16.msra.mxu0 %v758_v49 }
  0x66   :  { %386 = vmatpush1.bf16.msra.mxu1 %v723_v23  ;;  %675 = vmatprep.subr.bf16.mxu0 %v759_v50 }
  0x67   :  { %387 = vmatprep.subr.bf16.mxu1 %v724_v24 }
  0x69   :  { %676 = vmatpush3.bf16.msra.mxu0 %v760_v51 }
  0x6a   :  { %388 = vmatpush1.bf16.msra.mxu1 %v726_v25  ;;  %677 = vmatprep.subr.bf16.mxu0 %v761_v52  ;;  %v650_v25 = vld [vmem:[%s1028_s7] ss:$0 sm:$0xff] }
  0x6b   :  { %389 = vmatprep.subr.bf16.mxu1 %v727_v26 }
  0x6d   :  { %678 = vmatpush3.bf16.msra.mxu0 %v762_v53 }
  0x6e   :  { %390 = vmatpush1.bf16.msra.mxu1 %v729_v27  ;;  %679 = vmatprep.subr.bf16.mxu0 %v763_v7 }
  0x6f   :  { %391 = vmatprep.subr.bf16.mxu1 %v730_v28 }
  0x71   :  { %680 = vmatpush3.bf16.msra.mxu0 %v764_v8 }
  0x72   :  { %392 = vmatpush1.bf16.msra.mxu1 %v732_v29  ;;  %681 = vmatprep.subr.bf16.mxu0 %v765_v9 }
  0x73   :  { %393 = vmatprep.subr.bf16.mxu1 %v733_v30 }
  0x75   :  { %682 = vmatpush3.bf16.msra.mxu0 %v766_v10 }
  0x76   :  { %394 = vmatpush1.bf16.msra.mxu1 %v735_v31  ;;  %v594_v31 = vstv %s1021_s0 }
  0x77   :  { %395 = vmatprep.subr.bf16.mxu1 %v736_v32 }
  0x7a   :  { %396 = vmatpush1.bf16.msra.mxu1 %v738_v33 }
  0x7b   :  { %397 = vmatprep.subr.bf16.mxu1 %v739_v34 }
  0x7e   :  { %398 = vmatpush1.bf16.msra.mxu1 %v741_v35 }
  0x7f   :  { %399 = vmatprep.subr.bf16.mxu1 %v742_v36 }
  0x82   :  { %400 = vmatpush1.bf16.msra.mxu1 %v744_v37 }
  0x83   :  { %401 = vmatprep.subr.bf16.mxu1 %v745_v38 }
  0x86   :  { %402 = vmatpush1.bf16.msra.mxu1 %v747_v39 }
  0x87   :  { %403 = vmatprep.subr.bf16.mxu1 %v748_v40 }
  0x8a   :  { %404 = vmatpush1.bf16.msra.mxu1 %v750_v41 }
 0x126   :  { %v158_v61 = vpop.f32.mrb[0].mxu0 }
 0x127   :  { %v159_v62 = vadd.f32 %v158_v61, %v95_v59  ;;  %v160_v63 = vpop.f32.mrb[1].mxu0 }
 0x128   :  { %v161_v0 = vadd.f32 %v160_v63, %v99_v60  ;;  %v162_v1 = vpop.f32.mrb[2].mxu0 }
 0x129   :  { %v165_v2 = vmax.f32 %v159_v62, 0.0  ;;  %v163_v3 = vpop.f32.mrb[3].mxu0 }
 0x12a   :  { %v166_v4 = vmax.f32 %v161_v0, 0.0 }
 0x12b   :  { %v167_v6 = vpack.c.bf16 %v165_v2, %v165_v2 }
 0x12c   :  { %v168_v5 = vpack.c.bf16 %v166_v4, %v166_v4 }
 0x12e   :  { %405 = vmatprep.mubr.bf16.mxu1 %v168_v5 }
 0x12f   :  { %406 = vmatmul.mubr.bf16.vlgmr.msra.gmra.mrb[0].mxu1 %v167_v6 }
 0x202   :  { %v407_v14 = vpop.f32.mrb[0].mxu1 }
 0x203   :  { %v408_v15 = vadd.f32 %v407_v14, %v206_v12  ;;  %v409_v16 = vpop.f32.mrb[1].mxu1 }
 0x204   :  { %v410_v17 = vadd.f32 %v409_v16, %v210_v13  ;;  %v411_v18 = vpop.f32.mrb[2].mxu1 }
 0x205   :  { %v414_v19 = vmax.f32 %v408_v15, 0.0  ;;  %v412_v20 = vpop.f32.mrb[3].mxu1 }
 0x206   :  { %v415_v21 = vmax.f32 %v410_v17, 0.0 }
 0x207   :  { %v416_v23 = vpack.c.bf16 %v414_v19, %v414_v19 }
 0x208   :  { %v417_v22 = vpack.c.bf16 %v415_v21, %v415_v21 }
 0x20a   :  { %585 = vmatprep.mubr.bf16.mxu0 %v417_v22 }
 0x20b   :  { %586 = vmatmul.mubr.bf16.vlgmr.msra.gmra.mrb[4].mxu0 %v416_v23 }
 0x2de   :  { %v683_v24 = vpop.f32.mrb[4].mxu0 }
 0x2df   :  { %v684_v26 = vpop.f32.mrb[5].mxu0 }
 0x2e0   :  { %v685_v27 = vadd.f32 %v684_v26, %v683_v24  ;;  %v686_v28 = vpop.f32.mrb[6].mxu0 }
 0x2e1   :  { %v687_v29 = vpop.f32.mrb[7].mxu0 }
 0x2e2   :  { %v588_v30 = vadd.f32 %v685_v27, %v650_v25 }
 0x2e4   :  { %767 = vtanh.f32 %v588_v30 }
 0x2ee   :  { %v768_v32 = vpop.eup %767 }
 0x2ef   :  { %v595_v33 = vmul.f32 %v768_v32, %v594_v31 }
 0x2f1   :  { %v596_v34 = vpack.c.bf16 %v595_v33, %v595_v33 }
 0x2f3   :  { %597 = vst [vmem:[#allocation11] sm:$0xf] %v596_v34 }
 0x2f4   :  { %868 = shalt.err (!%p865_p8)
}
 0x2f5   :  { %s869_s1 = scalar_lea.hbm %s1029_s8, 64 }
 0x2f6   :  { %p870_p9 = scmp.ne.s32.totalorder %s1029_s8, %s869_s1  ;;  %p873_p10 = scmp.lt.u32.totalorder %s869_s1, %s1029_s8 }
 0x2f8   :  { %p875_p11 = pnand %p873_p10, %p870_p9 }
 0x2fa   :  { %878 = shalt.err (!%p875_p11)
}
 0x2fb   :  { %607 = dma.vmem_to_hbm [thread:$0]  %s605_s17, 64, %s1029_s8, [#allocation5]  }
 0x2fc   :  { %885 = dma.done.wait [#allocation5], 64  }
 0x2fd   :  { %886 = vsyncadd [#allocation5], 4294967232 }
 0x2fe   :  { %611 = vsyncpa [#allocation4], 1 }
 0x2ff   :  { %612 = vsyncpa [#allocation7], 1 }
 0x300   :  { %613 = vsyncpa [#allocation10], 1 }
 0x301   :  { %614 = vsyncpa [#allocation5], 1 }

</bundles_post_ra>
